<compile_context>
chip_gen: v7x
topology: tpu7x:2x2x1
jax: 0.10.0
libtpu: 0.0.40
codegen_flags: <defaults>
</compile_context>

<pallas_src>
from functools import partial

import jax
import jax.numpy as jnp
from jax import lax
from jax.experimental import pallas as pl
from jax.experimental.pallas import tpu as pltpu

EPS = 1e-4          # nn.BatchNorm1d eps as configured by the module
LANE = 128          # TPU lane width; K/N padding + output tile granule
SUBLANE_BF16 = 16   # bf16 sublane packing granule


def _round_up(n, m):
    return ((n + m - 1) // m) * m


def _pick_tn(out_pad, tn_req):
    """Largest lane-multiple tile <= tn_req that divides out_pad, preferring
    >= 2 grid steps so v7x's two TensorCores both get work."""
    tn_req = max(LANE, min(tn_req, out_pad))
    cands = [c for c in range(LANE, tn_req + 1, LANE) if out_pad % c == 0]
    multi = [c for c in cands if out_pad // c >= 2]
    return (multi or cands)[-1]


def _linear_bn_relu_kernel(x_ref, wt_ref, o_ref, *, inv_b, b_valid):
    # x_ref : [B_pad, K_pad]  bf16 -- whole (padded) batch, same block each step
    # wt_ref: [K_pad, TN]     bf16 -- one tile of W^T along out_features
    # o_ref : [B_pad, TN]     f32
    # Linear (no bias): MXU-canonical [B,K] x [K,TN], f32 accumulation.
    y = jnp.dot(x_ref[...], wt_ref[...], preferred_element_type=jnp.float32)

    # BatchNorm1d training-mode stats (biased variance over the real batch).
    # Padded batch rows are exact zeros -> contribute nothing to the mean sum;
    # they are masked out of the centered variance pass below.
    mean = jnp.sum(y, axis=0, keepdims=True) * inv_b            # [1, TN]
    diff = y - mean
    if b_valid != y.shape[0]:
        rows = lax.broadcasted_iota(jnp.int32, y.shape, 0)
        diff = jnp.where(rows < b_valid, diff, 0.0)
    var = jnp.sum(diff * diff, axis=0, keepdims=True) * inv_b   # [1, TN]

    y_norm = (y - mean) * lax.rsqrt(var + EPS)   # affine=False: no gamma/beta
    o_ref[...] = jnp.maximum(y_norm, 0.0).astype(o_ref.dtype)   # ReLU


def linear_bn_relu(x, w, *, tn=256):
    """Fused Linear(bias=False) + BatchNorm1d(eps=1e-4, affine=False, training) + ReLU.

    x: [B, in_features] activations (f32)
    w: [out_features, in_features] Linear weight (PyTorch layout, f32)
    returns: [B, out_features] float32
    """
    B, in_f = x.shape
    out_f, in_f_w = w.shape
    assert in_f == in_f_w, "weight/input feature mismatch"

    b_pad = _round_up(B, SUBLANE_BF16)     # bf16 sublane-dense batch dim
    k_pad = _round_up(in_f, LANE)          # lane-dense K, full MXU K usage
    out_pad = _round_up(out_f, LANE)       # lane-dense output stores
    tn = _pick_tn(out_pad, tn)
    grid = (out_pad // tn,)                # tile over N only; batch stays whole

    # Operand prep (one-time XLA cost): bf16 cast, zero padding, W pre-transpose.
    x_p = x.astype(jnp.bfloat16)
    if b_pad != B or k_pad != in_f:
        x_p = jnp.pad(x_p, ((0, b_pad - B), (0, k_pad - in_f)))
    wt = w.T.astype(jnp.bfloat16)          # [in_f, out_f], MXU-canonical layout
    if k_pad != in_f or out_pad != out_f:
        wt = jnp.pad(wt, ((0, k_pad - in_f), (0, out_pad - out_f)))

    # Advisory cost model for XLA scheduling around this custom call.
    cost = pl.CostEstimate(
        flops=2 * b_pad * k_pad * out_pad,
        transcendentals=out_pad,                         # one rsqrt per feature
        bytes_accessed=(b_pad * k_pad * 2 + k_pad * out_pad * 2
                        + b_pad * out_pad * 4),
    )

    # Per-step VMEM footprint (double-buffered inputs/outputs) with headroom,
    # clamped to v7x's 64 MiB physical VMEM.
    step_bytes = (2 * b_pad * k_pad * 2        # x (bf16), 2 buffers
                  + 2 * k_pad * tn * 2         # W tile (bf16), 2 buffers
                  + 2 * b_pad * tn * 4)        # out tile (f32), 2 buffers
    vmem_limit = int(min(64 * 2**20, max(32 * 2**20, 2 * step_bytes)))

    out = pl.pallas_call(
        partial(_linear_bn_relu_kernel, inv_b=float(1.0 / B), b_valid=B),
        out_shape=jax.ShapeDtypeStruct((b_pad, out_pad), jnp.float32),
        grid_spec=pltpu.PrefetchScalarGridSpec(
            num_scalar_prefetch=0,
            grid=grid,
            in_specs=[
                # x: constant block index -> Pallas does not re-DMA it per step.
                pl.BlockSpec((b_pad, k_pad), lambda j: (0, 0)),
                # W^T: blocked along out_features.
                pl.BlockSpec((k_pad, tn), lambda j: (0, j)),
            ],
            out_specs=pl.BlockSpec((b_pad, tn), lambda j: (0, j)),
        ),
        compiler_params=pltpu.CompilerParams(
            # N tiles are fully independent (per-feature BN) -> parallel axis
            # (shards across both TensorCores on v7x when grid >= 2 steps).
            dimension_semantics=("parallel",),
            vmem_limit_bytes=vmem_limit,
        ),
        cost_estimate=cost,
    )(x_p, wt)

    # Slice off padding only when it exists (skip the extra copy otherwise).
    # NOTE: emit bf16 here instead if the next layer consumes bf16.
    if b_pad != B or out_pad != out_f:
        out = out[:B, :out_f]
    return out


def reference(x, w):
    # Mirrors the kernel's bf16 MXU operands with f32 accumulation, then the
    # exact f32 BN (biased batch variance) + ReLU of the PyTorch module.
    y = jnp.dot(x.astype(jnp.bfloat16), w.astype(jnp.bfloat16).T,
                preferred_element_type=jnp.float32)
    mean = jnp.mean(y, axis=0, keepdims=True)
    var = jnp.mean((y - mean) ** 2, axis=0, keepdims=True)
    return jnp.maximum((y - mean) / jnp.sqrt(var + EPS), 0.0)


if __name__ == "__main__":
    key = jax.random.PRNGKey(0)
    kx, kw = jax.random.split(key)

    B, in_features, out_features = 8, 32, 64

    # Deterministic parameter init mimicking nn.Linear default:
    # uniform(-1/sqrt(in_features), 1/sqrt(in_features))
    bound = 1.0 / (in_features ** 0.5)
    w = jax.random.uniform(kw, (out_features, in_features),
                           minval=-bound, maxval=bound, dtype=jnp.float32)
    x = jax.random.normal(kx, (B, in_features), dtype=jnp.float32)

    out = jax.block_until_ready(linear_bn_relu(x, w))
    ref = reference(x, w)

    assert out.shape == (B, out_features)
    assert bool(jnp.all(jnp.isfinite(out))), "non-finite output"
    assert jnp.allclose(out, ref, atol=1e-2, rtol=1e-2), "mismatch vs reference"

    print("KERNEL_OK")
</pallas_src>

<mosaic_0001>
module attributes {stable_mosaic.version = 11 : i64} {
  func.func @_linear_bn_relu_kernel(%arg0: i32, %arg1: memref<16x128xbf16, #tpu.memory_space<vmem>>, %arg2: memref<128x128xbf16, #tpu.memory_space<vmem>>, %arg3: memref<16x128xf32, #tpu.memory_space<vmem>>) attributes {dimension_semantics = [#tpu.dimension_semantics<parallel>], iteration_bounds = array<i64: 1>, scalar_prefetch = 0 : i64, scratch_operands = 0 : i64, tpu.core_type = #tpu.core_type<tc>, window_params = [{pipeline_mode = #tpu.pipeline_mode<synchronous>, transform_indices = @transform_0, window_bounds = array<i64: 16, 128>}, {transform_indices = @transform_1, window_bounds = array<i64: 128, 128>}, {transform_indices = @transform_2, window_bounds = array<i64: 16, 128>}]} {
    %c0 = arith.constant 0 : index
    %c0_0 = arith.constant 0 : index
    %0 = vector.load %arg1[%c0, %c0_0] : memref<16x128xbf16, #tpu.memory_space<vmem>>, vector<16x128xbf16>
    %c0_1 = arith.constant 0 : index
    %c0_2 = arith.constant 0 : index
    %1 = vector.load %arg2[%c0_1, %c0_2] : memref<128x128xbf16, #tpu.memory_space<vmem>>, vector<128x128xbf16>
    %cst = arith.constant dense<0.000000e+00> : vector<16x128xf32>
    %2 = tpu.matmul %0, %1, %cst {dimension_numbers = #tpu.dot_dimension_numbers<[1], [0], [0], [1], [0, 0, 1, 1], [], []>} : vector<16x128xbf16>, vector<128x128xbf16>, vector<16x128xf32> -> vector<16x128xf32>
    %cst_3 = arith.constant dense<0.000000e+00> : vector<128xf32>
    %3 = vector.multi_reduction <add>, %2, %cst_3 [0] : vector<16x128xf32> to vector<128xf32>
    %4 = vector.shape_cast %3 : vector<128xf32> to vector<1x128xf32>
    %cst_4 = arith.constant 1.250000e-01 : f32
    %5 = vector.broadcast %cst_4 : f32 to vector<1x128xf32>
    %6 = arith.mulf %4, %5 : vector<1x128xf32>
    %7 = vector.broadcast %6 : vector<1x128xf32> to vector<16x128xf32>
    %8 = arith.subf %2, %7 : vector<16x128xf32>
    %9 = tpu.iota {dimensions = array<i32: 0>} : vector<16x128xi32>
    %c8_i32 = arith.constant 8 : i32
    %10 = vector.broadcast %c8_i32 : i32 to vector<16x128xi32>
    %11 = arith.cmpi slt, %9, %10 : vector<16x128xi32>
    %cst_5 = arith.constant 0.000000e+00 : f32
    %12 = vector.broadcast %cst_5 : f32 to vector<16x128xf32>
    %13 = arith.select %11, %8, %12 : vector<16x128xi1>, vector<16x128xf32>
    %14 = arith.mulf %13, %13 : vector<16x128xf32>
    %cst_6 = arith.constant dense<0.000000e+00> : vector<128xf32>
    %15 = vector.multi_reduction <add>, %14, %cst_6 [0] : vector<16x128xf32> to vector<128xf32>
    %16 = vector.shape_cast %15 : vector<128xf32> to vector<1x128xf32>
    %cst_7 = arith.constant 1.250000e-01 : f32
    %17 = vector.broadcast %cst_7 : f32 to vector<1x128xf32>
    %18 = arith.mulf %16, %17 : vector<1x128xf32>
    %19 = vector.broadcast %6 : vector<1x128xf32> to vector<16x128xf32>
    %20 = arith.subf %2, %19 : vector<16x128xf32>
    %cst_8 = arith.constant 9.99999974E-5 : f32
    %21 = vector.broadcast %cst_8 : f32 to vector<1x128xf32>
    %22 = arith.addf %18, %21 : vector<1x128xf32>
    %23 = math.rsqrt %22 : vector<1x128xf32>
    %24 = vector.broadcast %23 : vector<1x128xf32> to vector<16x128xf32>
    %25 = arith.mulf %20, %24 : vector<16x128xf32>
    %cst_9 = arith.constant 0.000000e+00 : f32
    %26 = vector.broadcast %cst_9 : f32 to vector<16x128xf32>
    %27 = arith.maximumf %25, %26 : vector<16x128xf32>
    %c0_10 = arith.constant 0 : index
    %c0_11 = arith.constant 0 : index
    %28 = vector.load %arg3[%c0_10, %c0_11] : memref<16x128xf32, #tpu.memory_space<vmem>>, vector<16x128xf32>
    tpu.vector_store %arg3[%c0_10, %c0_11], %27 {strides = array<i32>} : memref<16x128xf32, #tpu.memory_space<vmem>>, vector<16x128xf32>,
    return
  }
  func.func @transform_0(%arg0: i32) -> (i32, i32) {
    %c0_i32 = arith.constant 0 : i32
    %c0_i32_0 = arith.constant 0 : i32
    %c0_i32_1 = arith.constant 0 : i32
    return %c0_i32, %c0_i32_0 : i32, i32
  }
  func.func @transform_1(%arg0: i32) -> (i32, i32) {
    %c0_i32 = arith.constant 0 : i32
    %c0_i32_0 = arith.constant 0 : i32
    return %c0_i32, %arg0 : i32, i32
  }
  func.func @transform_2(%arg0: i32) -> (i32, i32) {
    %c0_i32 = arith.constant 0 : i32
    %c0_i32_0 = arith.constant 0 : i32
    return %c0_i32, %arg0 : i32, i32
  }
}

</mosaic_0001>

<bundles_post_ra>
// kernel: tpu_custom_call.1
= control target key start
LH: loop header
LB: loop body
LE: loop exit
PB: predicated region body
PF: predicated region fallthrough
CT: control target
= control target key end

     0   :  { %7 = vsyncpa [#allocation3], 0  ;;  %s397_s0 = inlined_call_operand.hbm [shape: bf16[16,128], index: 0, kind: input, shape index: {}]   ;;  %s398_s1 = inlined_call_operand.hbm [shape: bf16[128,128], index: 1, kind: input, shape index: {}]   ;;  %s399_s2 = inlined_call_operand.hbm [shape: f32[16,128], index: 2, kind: output, shape index: {}]  }
   0x1   :  { %8 = vsyncpa [#allocation6], 0 }
   0x2   :  { %9 = vsyncpa [#allocation4], 0  ;;  %s337_s9 = smov [#allocation2]   ;;  %s265_s13 = scalar_lea.hbm %s397_s0, 128 }
   0x3   :  { %s15_s10 = sshll.u32 %s337_s9, 4  ;;  %p266_p0 = scmp.ne.s32.totalorder %s397_s0, %s265_s13  ;;  %s16_s10 = int_to_ptr.vmem [resolvable:$true] %s15_s10 }
   0x4   :  { %p269_p1 = scmp.lt.u32.totalorder %s265_s13, %s397_s0 }
   0x6   :  { %p271_p2 = pnand %p269_p1, %p266_p0 }
   0x8   :  { %274 = shalt.err (!%p271_p2)
}
   0x9   :  { %s275_s18 = scalar_lea.vmem %s16_s10, 128  ;;  %p280_p4 = scmp.lt.s32.totalorder %s16_s10, %s16_s10 }
   0xa   :  { %p276_p3 = scmp.ne.s32.totalorder %s16_s10, %s275_s18  ;;  %p281_p5 = scmp.lt.s32.totalorder %s275_s18, %s275_s18 }
   0xc   :  { %p282_p6 = por %p281_p5, %p280_p4 }
   0xe   :  { %p283_p7 = pnand %p282_p6, %p276_p3 }
  0x10   :  { %286 = shalt.err (!%p283_p7)
}
  0x11   :  { %s338_s19 = smov 64   ;;  %s339_s20 = smov 4  }
  0x12   :  { %21 = dma.hbm_to_vmem [thread:$0]  %s397_s0, 128, %s16_s10, [#allocation3], %s338_s19, %s338_s19, %s339_s20  }
  0x13   :  { %s340_s23 = smov [#allocation5]   ;;  %s287_s27 = scalar_lea.hbm %s398_s1, 1024 }
  0x14   :  { %s27_s24 = sshll.u32 %s340_s23, 4  ;;  %p288_p8 = scmp.ne.s32.totalorder %s398_s1, %s287_s27  ;;  %s28_s24 = int_to_ptr.vmem [resolvable:$true] %s27_s24 }
  0x15   :  { %p291_p9 = scmp.lt.u32.totalorder %s287_s27, %s398_s1 }
  0x17   :  { %p293_p10 = pnand %p291_p9, %p288_p8 }
  0x19   :  { %296 = shalt.err (!%p293_p10)
}
  0x1a   :  { %s297_s4 = scalar_lea.vmem %s28_s24, 1024  ;;  %p302_p12 = scmp.lt.s32.totalorder %s28_s24, %s28_s24 }
  0x1b   :  { %p298_p11 = scmp.ne.s32.totalorder %s28_s24, %s297_s4  ;;  %p303_p13 = scmp.lt.s32.totalorder %s297_s4, %s297_s4 }
  0x1d   :  { %p304_p0 = por %p303_p13, %p302_p12 }
  0x1f   :  { %p305_p1 = pnand %p304_p0, %p298_p11 }
  0x21   :  { %308 = shalt.err (!%p305_p1)
}
  0x22   :  { %33 = dma.hbm_to_vmem [thread:$0]  %s398_s1, 1024, %s28_s24, [#allocation6], %s338_s19, %s338_s19, %s339_s20  }
  0x23   :  { %331 = dma.done.wait [#allocation3], 128  }
  0x24   :  { %332 = vsyncadd [#allocation3], 4294967168 }
  0x25   :  { %333 = dma.done.wait [#allocation6], 1024  }
  0x26   :  { %334 = vsyncadd [#allocation6], 4294966272  ;;  %v341_v0 = vmov 0.0   ;;  %vm342_vm0 = vmmov 0   ;;  %v254_v1 = vld [vmem:[#allocation5] sm:$0xff]   ;;  %v255_v2 = vld [vmem:[#allocation5 + $0x8] sm:$0xff]  }
  0x27   :  { %225 = vmatprep.subr.bf16.mxu0 %v341_v0  ;;  %241 = vmatprep.mubr.msk.bf16.mxu0 %vm342_vm0, %v341_v0  ;;  %v256_v3 = vld [vmem:[#allocation5 + $0x10] sm:$0xff]   ;;  %v257_v4 = vld [vmem:[#allocation5 + $0x18] sm:$0xff]   ;;  %v258_v5 = vld [vmem:[#allocation5 + $0x20] sm:$0xff]   ;;  %s343_s1 = smov [#allocation7]  }
  0x28   :  { %226 = vmatpush3.bf16.msra.mxu0 %v254_v1  ;;  %v259_v6 = vld [vmem:[#allocation5 + $0x28] sm:$0xff]   ;;  %v260_v7 = vld [vmem:[#allocation5 + $0x30] sm:$0xff]   ;;  %v261_v8 = vld [vmem:[#allocation5 + $0x38] sm:$0xff]   ;;  %s194_s6 = sshll.u32 %s343_s1, 4  ;;  %s195_s6 = int_to_ptr.vmem [resolvable:$true] %s194_s6 }
  0x29   :  { %227 = vmatprep.subr.bf16.mxu0 %v341_v0  ;;  %v262_v9 = vld [vmem:[#allocation2] sm:$0xff]   ;;  %s309_s7 = scalar_lea.vmem %s195_s6, 256  ;;  %p314_p3 = scmp.lt.s32.totalorder %s195_s6, %s195_s6 }
  0x2a   :  { %p310_p2 = scmp.ne.s32.totalorder %s195_s6, %s309_s7  ;;  %p315_p4 = scmp.lt.s32.totalorder %s309_s7, %s309_s7 }
  0x2c   :  { %228 = vmatpush3.bf16.msra.mxu0 %v255_v2  ;;  %p316_p5 = por %p315_p4, %p314_p3 }
  0x2d   :  { %229 = vmatprep.subr.bf16.mxu0 %v341_v0 }
  0x2e   :  { %p317_p6 = pnand %p316_p5, %p310_p2 }
  0x30   :  { %230 = vmatpush3.bf16.msra.mxu0 %v256_v3 }
  0x31   :  { %231 = vmatprep.subr.bf16.mxu0 %v341_v0 }
  0x34   :  { %232 = vmatpush3.bf16.msra.mxu0 %v257_v4 }
  0x35   :  { %233 = vmatprep.subr.bf16.mxu0 %v341_v0 }
  0x38   :  { %234 = vmatpush3.bf16.msra.mxu0 %v258_v5 }
  0x39   :  { %235 = vmatprep.subr.bf16.mxu0 %v341_v0 }
  0x3c   :  { %236 = vmatpush3.bf16.msra.mxu0 %v259_v6 }
  0x3d   :  { %237 = vmatprep.subr.bf16.mxu0 %v341_v0 }
  0x40   :  { %238 = vmatpush3.bf16.msra.mxu0 %v260_v7 }
  0x41   :  { %239 = vmatprep.subr.bf16.mxu0 %v341_v0 }
  0x44   :  { %240 = vmatpush3.bf16.msra.mxu0 %v261_v8 }
  0x47   :  { %242 = vmatmul.mubr.bf16.vlgmr.msra.gmra.mrb[0].mxu0 %v262_v9 }
 0x11a   :  { %v147_v10 = vpop.f32.mrb[0].mxu0 }
 0x11b   :  { %v243_v11 = vpop.f32.mrb[1].mxu0 }
 0x11c   :  { %v150_v12 = vpop.f32.mrb[2].mxu0 }
 0x11d   :  { %v154_v13 = vadd.f32 %v150_v12, %v147_v10  ;;  %v244_v14 = vpop.f32.mrb[3].mxu0 }
 0x11f   :  { %v155_v15 = vrot.slane %v154_v13, 4 }
 0x121   :  { %v156_v16 = vadd.f32 %v155_v15, %v154_v13 }
 0x123   :  { %v157_v17 = vrot.slane %v156_v16, 2 }
 0x125   :  { %v158_v18 = vadd.f32 %v157_v17, %v156_v16 }
 0x127   :  { %v159_v19 = vrot.slane %v158_v18, 1 }
 0x129   :  { %v160_v20 = vadd.f32 %v159_v19, %v158_v18 }
 0x12b   :  { %v161_v21 = vmul.f32 0.125, %v160_v20 }
 0x12d   :  { %v162_v22 = vsub.f32 %v147_v10, %v161_v21  ;;  %v163_v23 = vsub.f32 %v150_v12, %v161_v21 }
 0x12f   :  { %v171_v24 = vmul.f32 %v162_v22, %v162_v22 }
 0x131   :  { %v174_v25 = vrot.slane %v171_v24, 4 }
 0x133   :  { %v175_v26 = vadd.f32 %v174_v25, %v171_v24 }
 0x135   :  { %v176_v27 = vrot.slane %v175_v26, 2 }
 0x137   :  { %v177_v28 = vadd.f32 %v176_v27, %v175_v26 }
 0x139   :  { %v178_v29 = vrot.slane %v177_v28, 1 }
 0x13b   :  { %v179_v30 = vadd.f32 %v178_v29, %v177_v28 }
 0x13d   :  { %v180_v31 = vmul.f32 0.125, %v179_v30 }
 0x13f   :  { %v181_v32 = vadd.f32 0.0001, %v180_v31 }
 0x141   :  { %263 = vrsqrt.f32 %v181_v32 }
 0x14b   :  { %v264_v33 = vpop.eup %263 }
 0x14c   :  { %v183_v34 = vmul.f32 %v264_v33, %v162_v22  ;;  %v184_v35 = vmul.f32 %v264_v33, %v163_v23 }
 0x14e   :  { %v185_v36 = vmax.f32 %v183_v34, 0.0  ;;  %v186_v37 = vmax.f32 %v184_v35, 0.0 }
 0x150   :  { %188 = vst [vmem:[#allocation7 + $0x8] sm:$0xff] %v186_v37  ;;  %187 = vst [vmem:[#allocation7] sm:$0xff] %v185_v36 }
 0x151   :  { %320 = shalt.err (!%p317_p6)
}
 0x152   :  { %s321_s10 = scalar_lea.hbm %s399_s2, 256 }
 0x153   :  { %p322_p7 = scmp.ne.s32.totalorder %s399_s2, %s321_s10  ;;  %p325_p8 = scmp.lt.u32.totalorder %s321_s10, %s399_s2 }
 0x155   :  { %p327_p9 = pnand %p325_p8, %p322_p7 }
 0x157   :  { %330 = shalt.err (!%p327_p9)
}
 0x158   :  { %s344_s15 = smov 128   ;;  %s345_s16 = smov 8  }
 0x159   :  { %200 = dma.vmem_to_hbm [thread:$0]  %s195_s6, 256, %s399_s2, [#allocation4], %s344_s15, %s344_s15, %s345_s16  }
 0x15a   :  { %335 = dma.done.wait [#allocation4], 256  }
 0x15b   :  { %336 = vsyncadd [#allocation4], 4294967040 }
 0x15c   :  { %204 = vsyncpa [#allocation3], 1 }
 0x15d   :  { %205 = vsyncpa [#allocation6], 1 }
 0x15e   :  { %206 = vsyncpa [#allocation4], 1 }

</bundles_post_ra>
